<compile_context>
chip_gen: v5e
topology: v5e:2x2
jax: 0.10.0
libtpu: 0.0.40
codegen_flags: <defaults>
</compile_context>

<pallas_src>
import jax
import jax.numpy as jnp
from jax.experimental import pallas as pl
from jax.experimental.pallas import tpu as pltpu

EPS = 0.003
H1 = 256            # fcs1 output
H2 = 128            # fcs2 / fca1 / fc2 output
K_ALIGN = 16        # bf16 sublane packing for contraction dims
DEFAULT_TILE_M = 1024  # multiple of 256 -> fills MXU M dim on v6e/v7x


def _round_up(x, m):
    return -(-x // m) * m


def critic_kernel(state_ref, action_ref,
                  w_s1_ref, b_s1_ref,
                  w_s2_ref, b_s2_ref,
                  w_a1_ref, b_a1_ref,
                  w_fc2_s_ref, w_fc2_a_ref, b_fc2_ref,
                  w_fc3_ref, b_fc3_ref,
                  out_ref):
    f32 = jnp.float32
    bf16 = jnp.bfloat16

    # mirrors state.float() in PyTorch, then bf16 for the MXU (f32 accumulate)
    s = state_ref[...].astype(bf16)
    a = action_ref[...].astype(bf16)

    # s1 = relu(fcs1(state))
    s1 = jnp.dot(s, w_s1_ref[...], preferred_element_type=f32) + b_s1_ref[...]
    s1 = jnp.maximum(s1, 0.0).astype(bf16)

    # s2 = relu(fcs2(s1))
    s2 = jnp.dot(s1, w_s2_ref[...], preferred_element_type=f32) + b_s2_ref[...]
    s2 = jnp.maximum(s2, 0.0).astype(bf16)

    # a1 = relu(fca1(action))
    a1 = jnp.dot(a, w_a1_ref[...], preferred_element_type=f32) + b_a1_ref[...]
    a1 = jnp.maximum(a1, 0.0).astype(bf16)

    # x = relu(fc2(cat(s2, a1, dim=1)))  -- split matmul instead of concat
    x = (jnp.dot(s2, w_fc2_s_ref[...], preferred_element_type=f32)
         + jnp.dot(a1, w_fc2_a_ref[...], preferred_element_type=f32)
         + b_fc2_ref[...])
    x = jnp.maximum(x, 0.0)

    # q = fc3(x) as VPU multiply + lane reduce (avoids a [128,1] MXU matmul)
    q = jnp.sum(x * w_fc3_ref[...], axis=-1, keepdims=True) + b_fc3_ref[...]
    out_ref[...] = q.astype(out_ref.dtype)


def critic_forward(state, action, params, *, tile_m=DEFAULT_TILE_M):
    n, state_dim = state.shape
    _, action_dim = action.shape
    bf16 = jnp.bfloat16

    # Pad tiny contraction dims (zero rows/cols -> numerically identical).
    sdp = _round_up(state_dim, K_ALIGN)
    adp = _round_up(action_dim, K_ALIGN)
    state_p = jnp.pad(state.astype(jnp.float32), ((0, 0), (0, sdp - state_dim)))
    action_p = jnp.pad(action.astype(jnp.float32), ((0, 0), (0, adp - action_dim)))

    w_s1 = jnp.pad(params["w_s1"], ((0, sdp - state_dim), (0, 0))).astype(bf16)
    w_a1 = jnp.pad(params["w_a1"], ((0, adp - action_dim), (0, 0))).astype(bf16)
    w_s2 = params["w_s2"].astype(bf16)
    w_fc2_s = params["w_fc2_s"].astype(bf16)
    w_fc2_a = params["w_fc2_a"].astype(bf16)

    # Row tiling: tile_m never larger than the (8-aligned) batch.
    tile_m = int(min(tile_m, max(8, _round_up(n, 8))))
    n_pad = _round_up(n, tile_m)
    if n_pad != n:
        state_p = jnp.pad(state_p, ((0, n_pad - n), (0, 0)))
        action_p = jnp.pad(action_p, ((0, n_pad - n), (0, 0)))
    grid = (n_pad // tile_m,)

    inputs = (
        state_p, action_p,
        w_s1, params["b_s1"],
        w_s2, params["b_s2"],
        w_a1, params["b_a1"],
        w_fc2_s, w_fc2_a, params["b_fc2"],
        params["w_fc3"], params["b_fc3"],
    )

    def row_spec(d):
        return pl.BlockSpec((tile_m, d), lambda i: (i, 0))

    def resident_spec(arr):
        return pl.BlockSpec(arr.shape, lambda i: (0, 0))

    in_specs = [row_spec(sdp), row_spec(adp)] + [resident_spec(x) for x in inputs[2:]]
    out_specs = pl.BlockSpec((tile_m, 1), lambda i: (i, 0))

    flops_per_row = 2 * (sdp * H1 + H1 * H2 + adp * H2 + 2 * H2 * H2 + H2)
    weight_bytes = sum(int(x.size) * x.dtype.itemsize for x in inputs[2:])
    cost = pl.CostEstimate(
        flops=flops_per_row * n_pad,
        transcendentals=0,
        bytes_accessed=n_pad * (sdp + adp) * 4 + n_pad * 4 + weight_bytes,
    )

    out = pl.pallas_call(
        critic_kernel,
        out_shape=jax.ShapeDtypeStruct((n_pad, 1), jnp.float32),
        grid=grid,
        in_specs=in_specs,
        out_specs=out_specs,
        compiler_params=pltpu.CompilerParams(
            dimension_semantics=("parallel",),
            vmem_limit_bytes=32 * 1024 * 1024,
        ),
        cost_estimate=cost,
    )(*inputs)
    return out[:n]


def init_params(key, state_dim, action_dim):
    """Deterministic init matching the PyTorch module's scheme.

    fanin_init(size) -> uniform(-1/sqrt(size[0]), 1/sqrt(size[0])) with size=[out,in]
    (reproducing the original code's use of size[0]).
    PyTorch Linear default bias init: uniform(-1/sqrt(in_features), 1/sqrt(in_features)).
    fc3 weight: uniform(-EPS, EPS).
    Weights are stored transposed, [in, out]; fc3 weight stored as [1, 128].
    """
    ks = jax.random.split(key, 10)

    def u(k, shape, bound):
        return jax.random.uniform(k, shape, jnp.float32, minval=-bound, maxval=bound)

    params = {}
    params["w_s1"] = u(ks[0], (state_dim, H1), 1.0 / jnp.sqrt(float(H1)))
    params["b_s1"] = u(ks[1], (1, H1), 1.0 / jnp.sqrt(float(state_dim)))
    params["w_s2"] = u(ks[2], (H1, H2), 1.0 / jnp.sqrt(float(H2)))
    params["b_s2"] = u(ks[3], (1, H2), 1.0 / jnp.sqrt(float(H1)))
    params["w_a1"] = u(ks[4], (action_dim, H2), 1.0 / jnp.sqrt(float(H2)))
    params["b_a1"] = u(ks[5], (1, H2), 1.0 / jnp.sqrt(float(action_dim)))
    w_fc2 = u(ks[6], (H1, H2), 1.0 / jnp.sqrt(float(H2)))
    params["w_fc2_s"] = w_fc2[:H2, :]      # multiplies s2  (first 128 input cols)
    params["w_fc2_a"] = w_fc2[H2:, :]      # multiplies a1  (last 128 input cols)
    params["b_fc2"] = u(ks[7], (1, H2), 1.0 / jnp.sqrt(float(H1)))
    params["w_fc3"] = u(ks[8], (1, H2), EPS)                       # [1, 128]
    params["b_fc3"] = u(ks[9], (1, 1), 1.0 / jnp.sqrt(float(H2)))
    return params


def critic_reference(state, action, params, *, use_bf16=False):
    """Pure-JAX reference mirroring the PyTorch forward.

    With use_bf16=True it quantizes matmul inputs exactly like the kernel
    (bf16 operands, f32 accumulation), for a tight numerical comparison.
    """
    f32 = jnp.float32
    cast = (lambda v: v.astype(jnp.bfloat16)) if use_bf16 else (lambda v: v)

    def lin(x, w, b):
        return jnp.dot(cast(x), cast(w), preferred_element_type=f32) + b

    s1 = jax.nn.relu(lin(state.astype(f32), params["w_s1"], params["b_s1"]))
    s2 = jax.nn.relu(lin(s1, params["w_s2"], params["b_s2"]))
    a1 = jax.nn.relu(lin(action.astype(f32), params["w_a1"], params["b_a1"]))
    x = jnp.concatenate([s2, a1], axis=1)
    w_fc2 = jnp.concatenate([params["w_fc2_s"], params["w_fc2_a"]], axis=0)
    x = jax.nn.relu(lin(x, w_fc2, params["b_fc2"]))
    return jnp.sum(x * params["w_fc3"], axis=-1, keepdims=True) + params["b_fc3"]


if __name__ == "__main__":
    batch, state_dim, action_dim = 8, 16, 4

    key = jax.random.PRNGKey(0)
    k_params, k_state, k_action = jax.random.split(key, 3)

    params = init_params(k_params, state_dim, action_dim)
    state = jax.random.normal(k_state, (batch, state_dim), jnp.float32)
    action = jax.random.normal(k_action, (batch, action_dim), jnp.float32)

    q = critic_forward(state, action, params)
    q = jax.block_until_ready(q)

    q_ref_bf16 = critic_reference(state, action, params, use_bf16=True)
    q_ref_f32 = critic_reference(state, action, params, use_bf16=False)

    assert q.shape == (batch, 1)
    # tight check vs a reference with identical bf16/f32 mixed-precision math
    assert jnp.allclose(q, q_ref_bf16, atol=1e-3, rtol=1e-3)
    # loose sanity check vs the pure-f32 PyTorch-equivalent forward
    assert jnp.allclose(q, q_ref_f32, atol=5e-2, rtol=5e-2)

    print("KERNEL_OK")
</pallas_src>

<mosaic_0001>
module attributes {stable_mosaic.version = 11 : i64} {
  func.func @critic_kernel(%arg0: i32, %arg1: memref<8x16xf32, #tpu.memory_space<vmem>>, %arg2: memref<8x16xf32, #tpu.memory_space<vmem>>, %arg3: memref<16x256xbf16, #tpu.memory_space<vmem>>, %arg4: memref<1x256xf32, #tpu.memory_space<vmem>>, %arg5: memref<256x128xbf16, #tpu.memory_space<vmem>>, %arg6: memref<1x128xf32, #tpu.memory_space<vmem>>, %arg7: memref<16x128xbf16, #tpu.memory_space<vmem>>, %arg8: memref<1x128xf32, #tpu.memory_space<vmem>>, %arg9: memref<128x128xbf16, #tpu.memory_space<vmem>>, %arg10: memref<128x128xbf16, #tpu.memory_space<vmem>>, %arg11: memref<1x128xf32, #tpu.memory_space<vmem>>, %arg12: memref<1x128xf32, #tpu.memory_space<vmem>>, %arg13: memref<1x1xf32, #tpu.memory_space<vmem>>, %arg14: memref<8x1xf32, #tpu.memory_space<vmem>>) attributes {dimension_semantics = [#tpu.dimension_semantics<parallel>], iteration_bounds = array<i64: 1>, scalar_prefetch = 0 : i64, scratch_operands = 0 : i64, tpu.core_type = #tpu.core_type<tc>, window_params = [{transform_indices = @transform_0, window_bounds = array<i64: 8, 16>}, {transform_indices = @transform_1, window_bounds = array<i64: 8, 16>}, {pipeline_mode = #tpu.pipeline_mode<synchronous>, transform_indices = @transform_2, window_bounds = array<i64: 16, 256>}, {pipeline_mode = #tpu.pipeline_mode<synchronous>, transform_indices = @transform_3, window_bounds = array<i64: 1, 256>}, {pipeline_mode = #tpu.pipeline_mode<synchronous>, transform_indices = @transform_4, window_bounds = array<i64: 256, 128>}, {pipeline_mode = #tpu.pipeline_mode<synchronous>, transform_indices = @transform_5, window_bounds = array<i64: 1, 128>}, {pipeline_mode = #tpu.pipeline_mode<synchronous>, transform_indices = @transform_6, window_bounds = array<i64: 16, 128>}, {pipeline_mode = #tpu.pipeline_mode<synchronous>, transform_indices = @transform_7, window_bounds = array<i64: 1, 128>}, {pipeline_mode = #tpu.pipeline_mode<synchronous>, transform_indices = @transform_8, window_bounds = array<i64: 128, 128>}, {pipeline_mode = #tpu.pipeline_mode<synchronous>, transform_indices = @transform_9, window_bounds = array<i64: 128, 128>}, {pipeline_mode = #tpu.pipeline_mode<synchronous>, transform_indices = @transform_10, window_bounds = array<i64: 1, 128>}, {pipeline_mode = #tpu.pipeline_mode<synchronous>, transform_indices = @transform_11, window_bounds = array<i64: 1, 128>}, {pipeline_mode = #tpu.pipeline_mode<synchronous>, transform_indices = @transform_12, window_bounds = array<i64: 1, 1>}, {transform_indices = @transform_13, window_bounds = array<i64: 8, 1>}]} {
    %c0 = arith.constant 0 : index
    %c0_0 = arith.constant 0 : index
    %0 = vector.load %arg1[%c0, %c0_0] : memref<8x16xf32, #tpu.memory_space<vmem>>, vector<8x16xf32>
    %1 = arith.truncf %0 : vector<8x16xf32> to vector<8x16xbf16>
    %c0_1 = arith.constant 0 : index
    %c0_2 = arith.constant 0 : index
    %2 = vector.load %arg2[%c0_1, %c0_2] : memref<8x16xf32, #tpu.memory_space<vmem>>, vector<8x16xf32>
    %3 = arith.truncf %2 : vector<8x16xf32> to vector<8x16xbf16>
    %c0_3 = arith.constant 0 : index
    %c0_4 = arith.constant 0 : index
    %4 = vector.load %arg3[%c0_3, %c0_4] : memref<16x256xbf16, #tpu.memory_space<vmem>>, vector<16x256xbf16>
    %cst = arith.constant dense<0.000000e+00> : vector<8x256xf32>
    %5 = tpu.matmul %1, %4, %cst {dimension_numbers = #tpu.dot_dimension_numbers<[1], [0], [0], [1], [0, 0, 1, 1], [], []>} : vector<8x16xbf16>, vector<16x256xbf16>, vector<8x256xf32> -> vector<8x256xf32>
    %c0_5 = arith.constant 0 : index
    %c0_6 = arith.constant 0 : index
    %6 = vector.load %arg4[%c0_5, %c0_6] : memref<1x256xf32, #tpu.memory_space<vmem>>, vector<1x256xf32>
    %7 = vector.broadcast %6 : vector<1x256xf32> to vector<8x256xf32>
    %8 = arith.addf %5, %7 : vector<8x256xf32>
    %cst_7 = arith.constant 0.000000e+00 : f32
    %9 = vector.broadcast %cst_7 : f32 to vector<8x256xf32>
    %10 = arith.maximumf %8, %9 : vector<8x256xf32>
    %11 = arith.truncf %10 : vector<8x256xf32> to vector<8x256xbf16>
    %c0_8 = arith.constant 0 : index
    %c0_9 = arith.constant 0 : index
    %12 = vector.load %arg5[%c0_8, %c0_9] : memref<256x128xbf16, #tpu.memory_space<vmem>>, vector<256x128xbf16>
    %cst_10 = arith.constant dense<0.000000e+00> : vector<8x128xf32>
    %13 = tpu.matmul %11, %12, %cst_10 {dimension_numbers = #tpu.dot_dimension_numbers<[1], [0], [0], [1], [0, 0, 1, 1], [], []>} : vector<8x256xbf16>, vector<256x128xbf16>, vector<8x128xf32> -> vector<8x128xf32>
    %c0_11 = arith.constant 0 : index
    %c0_12 = arith.constant 0 : index
    %14 = vector.load %arg6[%c0_11, %c0_12] : memref<1x128xf32, #tpu.memory_space<vmem>>, vector<1x128xf32>
    %15 = vector.broadcast %14 : vector<1x128xf32> to vector<8x128xf32>
    %16 = arith.addf %13, %15 : vector<8x128xf32>
    %cst_13 = arith.constant 0.000000e+00 : f32
    %17 = vector.broadcast %cst_13 : f32 to vector<8x128xf32>
    %18 = arith.maximumf %16, %17 : vector<8x128xf32>
    %19 = arith.truncf %18 : vector<8x128xf32> to vector<8x128xbf16>
    %c0_14 = arith.constant 0 : index
    %c0_15 = arith.constant 0 : index
    %20 = vector.load %arg7[%c0_14, %c0_15] : memref<16x128xbf16, #tpu.memory_space<vmem>>, vector<16x128xbf16>
    %cst_16 = arith.constant dense<0.000000e+00> : vector<8x128xf32>
    %21 = tpu.matmul %3, %20, %cst_16 {dimension_numbers = #tpu.dot_dimension_numbers<[1], [0], [0], [1], [0, 0, 1, 1], [], []>} : vector<8x16xbf16>, vector<16x128xbf16>, vector<8x128xf32> -> vector<8x128xf32>
    %c0_17 = arith.constant 0 : index
    %c0_18 = arith.constant 0 : index
    %22 = vector.load %arg8[%c0_17, %c0_18] : memref<1x128xf32, #tpu.memory_space<vmem>>, vector<1x128xf32>
    %23 = vector.broadcast %22 : vector<1x128xf32> to vector<8x128xf32>
    %24 = arith.addf %21, %23 : vector<8x128xf32>
    %cst_19 = arith.constant 0.000000e+00 : f32
    %25 = vector.broadcast %cst_19 : f32 to vector<8x128xf32>
    %26 = arith.maximumf %24, %25 : vector<8x128xf32>
    %27 = arith.truncf %26 : vector<8x128xf32> to vector<8x128xbf16>
    %c0_20 = arith.constant 0 : index
    %c0_21 = arith.constant 0 : index
    %28 = vector.load %arg9[%c0_20, %c0_21] : memref<128x128xbf16, #tpu.memory_space<vmem>>, vector<128x128xbf16>
    %cst_22 = arith.constant dense<0.000000e+00> : vector<8x128xf32>
    %29 = tpu.matmul %19, %28, %cst_22 {dimension_numbers = #tpu.dot_dimension_numbers<[1], [0], [0], [1], [0, 0, 1, 1], [], []>} : vector<8x128xbf16>, vector<128x128xbf16>, vector<8x128xf32> -> vector<8x128xf32>
    %c0_23 = arith.constant 0 : index
    %c0_24 = arith.constant 0 : index
    %30 = vector.load %arg10[%c0_23, %c0_24] : memref<128x128xbf16, #tpu.memory_space<vmem>>, vector<128x128xbf16>
    %cst_25 = arith.constant dense<0.000000e+00> : vector<8x128xf32>
    %31 = tpu.matmul %27, %30, %cst_25 {dimension_numbers = #tpu.dot_dimension_numbers<[1], [0], [0], [1], [0, 0, 1, 1], [], []>} : vector<8x128xbf16>, vector<128x128xbf16>, vector<8x128xf32> -> vector<8x128xf32>
    %32 = arith.addf %29, %31 : vector<8x128xf32>
    %c0_26 = arith.constant 0 : index
    %c0_27 = arith.constant 0 : index
    %33 = vector.load %arg11[%c0_26, %c0_27] : memref<1x128xf32, #tpu.memory_space<vmem>>, vector<1x128xf32>
    %34 = vector.broadcast %33 : vector<1x128xf32> to vector<8x128xf32>
    %35 = arith.addf %32, %34 : vector<8x128xf32>
    %cst_28 = arith.constant 0.000000e+00 : f32
    %36 = vector.broadcast %cst_28 : f32 to vector<8x128xf32>
    %37 = arith.maximumf %35, %36 : vector<8x128xf32>
    %c0_29 = arith.constant 0 : index
    %c0_30 = arith.constant 0 : index
    %38 = vector.load %arg12[%c0_29, %c0_30] : memref<1x128xf32, #tpu.memory_space<vmem>>, vector<1x128xf32>
    %39 = vector.broadcast %38 : vector<1x128xf32> to vector<8x128xf32>
    %40 = arith.mulf %37, %39 : vector<8x128xf32>
    %cst_31 = arith.constant dense<0.000000e+00> : vector<8xf32>
    %41 = vector.multi_reduction <add>, %40, %cst_31 [1] : vector<8x128xf32> to vector<8xf32>
    %42 = vector.shape_cast %41 : vector<8xf32> to vector<8x1xf32>
    %c0_32 = arith.constant 0 : index
    %c0_33 = arith.constant 0 : index
    %43 = vector.load %arg13[%c0_32, %c0_33] : memref<1x1xf32, #tpu.memory_space<vmem>>, vector<1x1xf32>
    %44 = vector.broadcast %43 : vector<1x1xf32> to vector<8x1xf32>
    %45 = arith.addf %42, %44 : vector<8x1xf32>
    %c0_34 = arith.constant 0 : index
    %c0_35 = arith.constant 0 : index
    %46 = vector.load %arg14[%c0_34, %c0_35] : memref<8x1xf32, #tpu.memory_space<vmem>>, vector<8x1xf32>
    tpu.vector_store %arg14[%c0_34, %c0_35], %45 {strides = array<i32>} : memref<8x1xf32, #tpu.memory_space<vmem>>, vector<8x1xf32>,
    return
  }
  func.func @transform_0(%arg0: i32) -> (i32, i32) {
    %c0_i32 = arith.constant 0 : i32
    %c0_i32_0 = arith.constant 0 : i32
    return %arg0, %c0_i32 : i32, i32
  }
  func.func @transform_1(%arg0: i32) -> (i32, i32) {
    %c0_i32 = arith.constant 0 : i32
    %c0_i32_0 = arith.constant 0 : i32
    return %arg0, %c0_i32 : i32, i32
  }
  func.func @transform_2(%arg0: i32) -> (i32, i32) {
    %c0_i32 = arith.constant 0 : i32
    %c0_i32_0 = arith.constant 0 : i32
    %c0_i32_1 = arith.constant 0 : i32
    return %c0_i32, %c0_i32_0 : i32, i32
  }
  func.func @transform_3(%arg0: i32) -> (i32, i32) {
    %c0_i32 = arith.constant 0 : i32
    %c0_i32_0 = arith.constant 0 : i32
    %c0_i32_1 = arith.constant 0 : i32
    return %c0_i32, %c0_i32_0 : i32, i32
  }
  func.func @transform_4(%arg0: i32) -> (i32, i32) {
    %c0_i32 = arith.constant 0 : i32
    %c0_i32_0 = arith.constant 0 : i32
    %c0_i32_1 = arith.constant 0 : i32
    return %c0_i32, %c0_i32_0 : i32, i32
  }
  func.func @transform_5(%arg0: i32) -> (i32, i32) {
    %c0_i32 = arith.constant 0 : i32
    %c0_i32_0 = arith.constant 0 : i32
    %c0_i32_1 = arith.constant 0 : i32
    return %c0_i32, %c0_i32_0 : i32, i32
  }
  func.func @transform_6(%arg0: i32) -> (i32, i32) {
    %c0_i32 = arith.constant 0 : i32
    %c0_i32_0 = arith.constant 0 : i32
    %c0_i32_1 = arith.constant 0 : i32
    return %c0_i32, %c0_i32_0 : i32, i32
  }
  func.func @transform_7(%arg0: i32) -> (i32, i32) {
    %c0_i32 = arith.constant 0 : i32
    %c0_i32_0 = arith.constant 0 : i32
    %c0_i32_1 = arith.constant 0 : i32
    return %c0_i32, %c0_i32_0 : i32, i32
  }
  func.func @transform_8(%arg0: i32) -> (i32, i32) {
    %c0_i32 = arith.constant 0 : i32
    %c0_i32_0 = arith.constant 0 : i32
    %c0_i32_1 = arith.constant 0 : i32
    return %c0_i32, %c0_i32_0 : i32, i32
  }
  func.func @transform_9(%arg0: i32) -> (i32, i32) {
    %c0_i32 = arith.constant 0 : i32
    %c0_i32_0 = arith.constant 0 : i32
    %c0_i32_1 = arith.constant 0 : i32
    return %c0_i32, %c0_i32_0 : i32, i32
  }
  func.func @transform_10(%arg0: i32) -> (i32, i32) {
    %c0_i32 = arith.constant 0 : i32
    %c0_i32_0 = arith.constant 0 : i32
    %c0_i32_1 = arith.constant 0 : i32
    return %c0_i32, %c0_i32_0 : i32, i32
  }
  func.func @transform_11(%arg0: i32) -> (i32, i32) {
    %c0_i32 = arith.constant 0 : i32
    %c0_i32_0 = arith.constant 0 : i32
    %c0_i32_1 = arith.constant 0 : i32
    return %c0_i32, %c0_i32_0 : i32, i32
  }
  func.func @transform_12(%arg0: i32) -> (i32, i32) {
    %c0_i32 = arith.constant 0 : i32
    %c0_i32_0 = arith.constant 0 : i32
    %c0_i32_1 = arith.constant 0 : i32
    return %c0_i32, %c0_i32_0 : i32, i32
  }
  func.func @transform_13(%arg0: i32) -> (i32, i32) {
    %c0_i32 = arith.constant 0 : i32
    %c0_i32_0 = arith.constant 0 : i32
    return %arg0, %c0_i32 : i32, i32
  }
}

</mosaic_0001>

<bundles_post_ra>
// kernel: tpu_custom_call.1
= control target key start
LH: loop header
LB: loop body
LE: loop exit
PB: predicated region body
PF: predicated region fallthrough
CT: control target
= control target key end

     0   :  { %s1088_s0 = inlined_call_operand.hbm [shape: f32[8,16], index: 0, kind: input, shape index: {}]   ;;  %s1089_s1 = inlined_call_operand.hbm [shape: f32[8,16], index: 1, kind: input, shape index: {}]   ;;  %s1090_s2 = inlined_call_operand.hbm [shape: bf16[16,256], index: 2, kind: input, shape index: {}]   ;;  %s1091_s3 = inlined_call_operand.vmem [shape: f32[1,256], index: 3, kind: input, shape index: {}]   ;;  %s1092_s4 = inlined_call_operand.hbm [shape: bf16[256,128], index: 4, kind: input, shape index: {}]   ;;  %s1093_s5 = inlined_call_operand.vmem [shape: f32[1,128], index: 5, kind: input, shape index: {}]   ;;  %s1094_s6 = inlined_call_operand.hbm [shape: bf16[16,128], index: 6, kind: input, shape index: {}]   ;;  %s1095_s7 = inlined_call_operand.vmem [shape: f32[1,128], index: 7, kind: input, shape index: {}]   ;;  %s1096_s8 = inlined_call_operand.hbm [shape: bf16[128,128], index: 8, kind: input, shape index: {}]   ;;  %s1097_s9 = inlined_call_operand.hbm [shape: bf16[128,128], index: 9, kind: input, shape index: {}]   ;;  %s1098_s10 = inlined_call_operand.vmem [shape: f32[1,128], index: 10, kind: input, shape index: {}]   ;;  %s1099_s11 = inlined_call_operand.vmem [shape: f32[1,128], index: 11, kind: input, shape index: {}]   ;;  %s1100_s12 = inlined_call_operand.<no memory space> [shape: f32[1,1], index: 12, kind: input, shape index: {}]   ;;  %s1101_s13 = inlined_call_operand.vmem [shape: f32[8,1], index: 13, kind: output, shape index: {}]  }
   0x1   :  { %v18_v0 = vstv %s1100_s12 }
   0x2   :  { %19 = vst [vmem:[#allocation2] sm:$0x1] %v18_v0 }
   0x3   :  { %20 = vsyncpa [#allocation4], 0 }
   0x4   :  { %21 = vsyncpa [#allocation6], 0 }
   0x5   :  { %22 = vsyncpa [#allocation9], 0  ;;  %s40_s29 = sshll.u32 %s1089_s1, 4  ;;  %s41_s29 = int_to_ptr.hbm [resolvable:$true] %s40_s29 }
   0x6   :  { %23 = vsyncpa [#allocation12], 0  ;;  %s950_s30 = smov [#allocation5]   ;;  %s65_s17 = sshll.u32 %s1092_s4, 4  ;;  %s66_s17 = int_to_ptr.hbm [resolvable:$true] %s65_s17 }
   0x7   :  { %s42_s14 = sshll.u32 %s950_s30, 4  ;;  %s951_s12 = smov [#allocation8]   ;;  %s43_s14 = int_to_ptr.vmem [resolvable:$true] %s42_s14 }
   0x8   :  { %45 = dma.hbm_to_vmem [thread:$0]  %s41_s29, 128, %s43_s14, [#allocation6]  }
   0x9   :  { %s67_s18 = sshll.u32 %s951_s12, 4  ;;  %s952_s19 = smov 64   ;;  %s68_s18 = int_to_ptr.vmem [resolvable:$true] %s67_s18 }
   0xa   :  { %s953_s20 = smov 4   ;;  %s95_s22 = sshll.u32 %s1096_s8, 4  ;;  %s96_s22 = int_to_ptr.hbm [resolvable:$true] %s95_s22 }
   0xb   :  { %73 = dma.hbm_to_vmem [thread:$0]  %s66_s17, 2048, %s68_s18, [#allocation9], %s952_s19, %s952_s19, %s953_s20  }
   0xc   :  { %s954_s23 = smov [#allocation11]   ;;  %s29_s26 = sshll.u32 %s1088_s0, 4  ;;  %s30_s26 = int_to_ptr.hbm [resolvable:$true] %s29_s26 }
   0xd   :  { %s97_s24 = sshll.u32 %s954_s23, 4  ;;  %s955_s27 = smov [#allocation3]   ;;  %s98_s24 = int_to_ptr.vmem [resolvable:$true] %s97_s24 }
   0xe   :  { %103 = dma.hbm_to_vmem [thread:$0]  %s96_s22, 1024, %s98_s24, [#allocation12], %s952_s19, %s952_s19, %s953_s20  }
   0xf   :  { %s31_s28 = sshll.u32 %s955_s27, 4  ;;  %s50_s14 = sshll.u32 %s1090_s2, 4  ;;  %s32_s28 = int_to_ptr.vmem [resolvable:$true] %s31_s28  ;;  %s51_s14 = int_to_ptr.hbm [resolvable:$true] %s50_s14 }
  0x10   :  { %34 = dma.hbm_to_vmem [thread:$0]  %s30_s26, 128, %s32_s28, [#allocation4]  }
  0x11   :  { %s956_s8 = smov [#allocation7]   ;;  %s80_s0 = sshll.u32 %s1094_s6, 4  ;;  %s81_s0 = int_to_ptr.hbm [resolvable:$true] %s80_s0 }
  0x12   :  { %s52_s15 = sshll.u32 %s956_s8, 4  ;;  %s957_s12 = smov 128   ;;  %s53_s15 = int_to_ptr.vmem [resolvable:$true] %s52_s15 }
  0x13   :  { %s958_s18 = smov 8   ;;  %s959_s1 = smov [#allocation10]  }
  0x14   :  { %58 = dma.hbm_to_vmem [thread:$0]  %s51_s14, 256, %s53_s15, [#allocation6], %s957_s12, %s957_s12, %s958_s18  }
  0x15   :  { %s82_s21 = sshll.u32 %s959_s1, 4  ;;  %s108_s2 = sshll.u32 %s1097_s9, 4  ;;  %s83_s21 = int_to_ptr.vmem [resolvable:$true] %s82_s21  ;;  %s109_s2 = int_to_ptr.hbm [resolvable:$true] %s108_s2 }
  0x16   :  { %88 = dma.hbm_to_vmem [thread:$0]  %s81_s0, 128, %s83_s21, [#allocation9], %s952_s19, %s952_s19, %s953_s20  }
  0x17   :  { %s960_s24 = smov [#allocation13]  }
  0x18   :  { %s110_s4 = sshll.u32 %s960_s24, 4  ;;  %s111_s4 = int_to_ptr.vmem [resolvable:$true] %s110_s4 }
  0x19   :  { %116 = dma.hbm_to_vmem [thread:$0]  %s109_s2, 1024, %s111_s4, [#allocation12], %s952_s19, %s952_s19, %s953_s20  }
  0x1a   :  { %942 = dma.done.wait [#allocation4], 128  }
  0x1b   :  { %943 = vsyncadd [#allocation4], 4294967168 }
  0x1c   :  { %944 = dma.done.wait [#allocation6], 384  }
  0x1d   :  { %945 = vsyncadd [#allocation6], 4294966912 }
  0x1e   :  { %946 = dma.done.wait [#allocation9], 2176  }
  0x1f   :  { %947 = vsyncadd [#allocation9], 4294965120 }
  0x20   :  { %948 = dma.done.wait [#allocation12], 2048  }
  0x21   :  { %949 = vsyncadd [#allocation12], 4294965248  ;;  %v582_v1 = vld [vmem:[#allocation7] sm:$0xf]  ;;  %v724_v2 = vld [vmem:[#allocation7 + $0x4] sm:$0xf0] }
  0x22   :  { %v723_v3 = vld [vmem:[#allocation7 + $0x4] sm:$0xf]  ;;  %v583_v4 = vor.u32 %v724_v2, %v582_v1  ;;  %v584_v5 = vld [vmem:[#allocation7 + $0x8] sm:$0xf0]  ;;  %v152_v6 = vld [vmem:[#allocation3] sm:$0xff]  ;;  %vm174_vm0 = vcmask 130048  }
  0x23   :  { %v740_v7 = vld [vmem:[#allocation8 + $0x78] sm:$0xff]  ;;  %v587_v8 = vor.u32 %v723_v3, %v584_v5  ;;  %v153_v9 = vpack.c.bf16 %v152_v6, %v152_v6  ;;  %v739_v11 = vld [vmem:[#allocation8 + $0x70] sm:$0xff]  ;;  %v738_v13 = vld [vmem:[#allocation8 + $0x68] sm:$0xff]  ;;  %vm570_vm1 = vcmask 7168  }
  0x24   :  { %v732_v10 = vld [vmem:[#allocation8 + $0x38] sm:$0xff]  ;;  %185 = vmatpush.bf16.msra.mxu2 %v583_v4  ;;  %353 = vmatpush.bf16.msra.mxu3 %v740_v7  ;;  %v731_v12 = vld [vmem:[#allocation8 + $0x30] sm:$0xff]  ;;  %v730_v14 = vld [vmem:[#allocation8 + $0x28] sm:$0xff] }
  0x25   :  { %198 = vmatpush.bf16.msra.mxu1 %v587_v8  ;;  %v737_v15 = vld [vmem:[#allocation8 + $0x60] sm:$0xff]  ;;  %v736_v17 = vld [vmem:[#allocation8 + $0x58] sm:$0xff]  ;;  %v735_v19 = vld [vmem:[#allocation8 + $0x50] sm:$0xff] }
  0x26   :  { %v729_v16 = vld [vmem:[#allocation8 + $0x20] sm:$0xff]  ;;  %v728_v18 = vld [vmem:[#allocation8 + $0x18] sm:$0xff]  ;;  %v734_v20 = vld [vmem:[#allocation8 + $0x48] sm:$0xff] }
  0x27   :  { %588 = vmatmul.msk.bf16.vlgmr.msra.gmra.mxu2 %vm174_vm0, %v153_v9  ;;  %v727_v21 = vld [vmem:[#allocation8 + $0x10] sm:$0xff]  ;;  %v733_v22 = vld [vmem:[#allocation8 + $0x40] sm:$0xff]  ;;  %v726_v23 = vld [vmem:[#allocation8 + $0x8] sm:$0xff] }
  0x28   :  { %340 = vmatpush.bf16.msrb.mxu2 %v732_v10  ;;  %589 = vmatmul.msk.bf16.vlgmr.msra.gmra.mxu1 %vm174_vm0, %v153_v9  ;;  %v725_v24 = vld [vmem:[#allocation8] sm:$0xff]  ;;  %v154_v26 = vld [vmem:[#allocation5] sm:$0xff]  ;;  %v756_v30 = vld [vmem:[#allocation13 + $0x30] sm:$0xff] }
  0x29   :  { %354 = vmatpush.bf16.msra.mxu3 %v739_v11  ;;  %v741_v25 = vld [vmem:[#allocation10] sm:$0xff]  ;;  %v155_v27 = vpack.c.bf16 %v154_v26, %v154_v26  ;;  %v748_v31 = vld [vmem:[#allocation11 + $0x30] sm:$0xff]  ;;  %v755_v32 = vld [vmem:[#allocation13 + $0x28] sm:$0xff] }
  0x2a   :  { %390 = vmatpush.bf16.msra.mxu0 %v741_v25  ;;  %v757_v28 = vld [vmem:[#allocation13 + $0x38] sm:$0xff]  ;;  %v747_v33 = vld [vmem:[#allocation11 + $0x28] sm:$0xff]  ;;  %v754_v34 = vld [vmem:[#allocation13 + $0x20] sm:$0xff] }
  0x2b   :  { %v749_v29 = vld [vmem:[#allocation11 + $0x38] sm:$0xff]  ;;  %478 = vmatpush.bf16.msrb.mxu1 %v757_v28  ;;  %v746_v35 = vld [vmem:[#allocation11 + $0x20] sm:$0xff]  ;;  %v752_v39 = vld [vmem:[#allocation13 + $0x10] sm:$0xff] }
  0x2c   :  { %341 = vmatpush.bf16.msrb.mxu2 %v731_v12  ;;  %v158_v36 = vld [vmem:[%s1091_s3] sm:$0x3]  ;;  %v751_v51 = vld [vmem:[#allocation13 + $0x8] sm:$0xff]  ;;  %v750_v55 = vld [vmem:[#allocation13] sm:$0xff] }
  0x2d   :  { %355 = vmatpush.bf16.msra.mxu3 %v738_v13  ;;  %658 = vmatmul.msk.bf16.vlgmr.msra.gmra.mxu0 %vm174_vm0, %v155_v27  ;;  %v753_v37 = vld [vmem:[#allocation13 + $0x18] sm:$0xff]  ;;  %v161_v38 = vperm.slane %v158_v36, 1  ;;  %v160_v42 = vperm.slane %v158_v36, 0  ;;  %v769_v53 = vld [vmem:[%s1095_s7] ss:$0 sm:$0xff]  ;;  %v743_v60 = vld [vmem:[#allocation11 + $0x8] sm:$0xff] }
  0x2e   :  { %539 = vmatpush.bf16.msrb.mxu0 %v749_v29  ;;  %v745_v52 = vld [vmem:[#allocation11 + $0x18] sm:$0xff]  ;;  %v744_v56 = vld [vmem:[#allocation11 + $0x10] sm:$0xff]  ;;  %v742_v62 = vld [vmem:[#allocation11] sm:$0xff] }
  0x2f   :  { %479 = vmatpush.bf16.msrb.mxu1 %v756_v30  ;;  %v770_v0 = vld [vmem:[%s1093_s5] ss:$0 sm:$0xff] }
  0x30   :  { %342 = vmatpush.bf16.msrb.mxu2 %v730_v14  ;;  %v771_v10 = vld [vmem:[%s1098_s10] ss:$0 sm:$0xff] }
  0x31   :  { %356 = vmatpush.bf16.msra.mxu3 %v737_v15  ;;  %v772_v14 = vld [vmem:[%s1099_s11] ss:$0 sm:$0xff] }
  0x32   :  { %540 = vmatpush.bf16.msrb.mxu0 %v748_v31 }
  0x33   :  { %480 = vmatpush.bf16.msrb.mxu1 %v755_v32 }
  0x34   :  { %343 = vmatpush.bf16.msrb.mxu2 %v729_v16 }
  0x35   :  { %357 = vmatpush.bf16.msra.mxu3 %v736_v17 }
  0x36   :  { %541 = vmatpush.bf16.msrb.mxu0 %v747_v33 }
  0x37   :  { %481 = vmatpush.bf16.msrb.mxu1 %v754_v34 }
  0x38   :  { %344 = vmatpush.bf16.msrb.mxu2 %v728_v18  ;;  %v773_v18 = vld [vmem:[#allocation2] ss:$0 sm:$0xff] }
  0x39   :  { %358 = vmatpush.bf16.msra.mxu3 %v735_v19 }
  0x3a   :  { %542 = vmatpush.bf16.msrb.mxu0 %v746_v35 }
  0x3b   :  { %482 = vmatpush.bf16.msrb.mxu1 %v753_v37 }
  0x3c   :  { %345 = vmatpush.bf16.msrb.mxu2 %v727_v21 }
  0x3d   :  { %359 = vmatpush.bf16.msra.mxu3 %v734_v20 }
  0x3e   :  { %543 = vmatpush.bf16.msrb.mxu0 %v745_v52 }
  0x3f   :  { %483 = vmatpush.bf16.msrb.mxu1 %v752_v39 }
  0x40   :  { %346 = vmatpush.bf16.msrb.mxu2 %v726_v23 }
  0x41   :  { %360 = vmatpush.bf16.msra.mxu3 %v733_v22 }
  0x42   :  { %544 = vmatpush.bf16.msrb.mxu0 %v744_v56 }
  0x43   :  { %484 = vmatpush.bf16.msrb.mxu1 %v751_v51 }
  0x44   :  { %347 = vmatpush.bf16.msrb.mxu2 %v725_v24 }
  0x46   :  { %545 = vmatpush.bf16.msrb.mxu0 %v743_v60 }
  0x47   :  { %485 = vmatpush.bf16.msrb.mxu1 %v750_v55 }
  0x4a   :  { %546 = vmatpush.bf16.msrb.mxu0 %v742_v62 }
  0xa5   :  { %v200_v40 = vpop.f32.mrf.mxu1 }
  0xa6   :  { %v201_v41 = vadd.f32 %v200_v40, %v161_v38 }
  0xa8   :  { %v205_v43 = vmax.f32 %v201_v41, 0.0 }
  0xaa   :  { %v187_v44 = vpop.f32.mrf.mxu2  ;;  %v207_v45 = vpack.c.bf16 %v205_v43, %v205_v43  ;;  %v392_v54 = vpop.f32.mrf.mxu0 }
  0xab   :  { %v188_v46 = vadd.f32 %v187_v44, %v160_v42  ;;  %v393_v57 = vadd.f32 %v769_v53, %v392_v54 }
  0xac   :  { %361 = vmatmul.bf16.vlgmr.msra.gmra.mxu3 %v207_v45 }
  0xad   :  { %v204_v47 = vmax.f32 %v188_v46, 0.0  ;;  %v202_v48 = vpop.f32.mrf.mxu1  ;;  %v396_v58 = vmax.f32 %v393_v57, 0.0 }
  0xaf   :  { %v206_v49 = vpack.c.bf16 %v204_v47, %v204_v47  ;;  %v397_v59 = vpack.c.bf16 %v396_v58, %v396_v58 }
  0xb1   :  { %348 = vmatmul.bf16.vlgmr.msrb.gmra.mxu2 %v206_v49  ;;  %486 = vmatmul.bf16.vlgmr.msrb.gmra.mxu1 %v397_v59 }
  0xb2   :  { %v189_v50 = vpop.f32.mrf.mxu2  ;;  %v394_v61 = vpop.f32.mrf.mxu0 }
 0x12e   :  { %v487_v8 = vpop.f32.mrf.mxu1 }
 0x12f   :  { %v362_v63 = vpop.f32.mrf.mxu3 }
 0x134   :  { %v349_v1 = vpop.f32.mrf.mxu2 }
 0x135   :  { %v350_v2 = vadd.f32 %v770_v0, %v349_v1 }
 0x136   :  { %v489_v9 = vpop.f32.mrf.mxu1 }
 0x137   :  { %v363_v3 = vadd.f32 %v362_v63, %v350_v2  ;;  %v364_v4 = vpop.f32.mrf.mxu3 }
 0x139   :  { %v366_v5 = vmax.f32 %v363_v3, 0.0 }
 0x13b   :  { %v367_v6 = vpack.c.bf16 %v366_v5, %v366_v5 }
 0x13c   :  { %v351_v7 = vpop.f32.mrf.mxu2 }
 0x13d   :  { %547 = vmatmul.bf16.vlgmr.msrb.gmra.mxu0 %v367_v6 }
 0x1ba   :  { %v548_v11 = vpop.f32.mrf.mxu0 }
 0x1bb   :  { %v549_v12 = vadd.f32 %v548_v11, %v487_v8 }
 0x1bd   :  { %v556_v13 = vadd.f32 %v771_v10, %v549_v12 }
 0x1bf   :  { %v557_v15 = vmax.f32 %v556_v13, 0.0 }
 0x1c1   :  { %v562_v16 = vmul.f32 %v772_v14, %v557_v15 }
 0x1c2   :  { %v550_v17 = vpop.f32.mrf.mxu0 }
 0x1c3   :  { %563 = vadd.xlane.f32.xlu0 %v562_v16 }
 0x236   :  { %v564_v19 = vpop.xlane.xlu0 %563 }
 0x237   :  { %v569_v20 = vadd.f32 %v773_v18, %v564_v19 }
 0x239   :  { %571 = vst.msk [vmem:[%s1101_s13] sm:$0xff] %vm570_vm1, %v569_v20 }
 0x23a   :  { %576 = vsyncpa [#allocation4], 1 }
 0x23b   :  { %577 = vsyncpa [#allocation6], 1 }
 0x23c   :  { %578 = vsyncpa [#allocation9], 1 }
 0x23d   :  { %579 = vsyncpa [#allocation12], 1 }

</bundles_post_ra>
